<compile_context>
chip_gen: v7x
topology: tpu7x:2x2x1
jax: 0.10.0
libtpu: 0.0.40
codegen_flags: <defaults>
</compile_context>

<pallas_src>
import functools

import jax
import jax.numpy as jnp
from jax.experimental import pallas as pl
from jax.experimental.pallas import tpu as pltpu


# ----------------------------- config ---------------------------------------
MASK_RATIO = 0.8
MASK_NOISE_SCALE = 0.1
PROJECTION_DIM = 128
LATENT_DIM = 64
NUM_QUBITS = 8                      # pqc.config.num_qubits (synthetic)
DEFAULT_MAX_ROWS_PER_TILE = 8192    # v7x-safe; v5e/v6e can pass 16384-32768


def _round_up(a, b):
    return ((a + b - 1) // b) * b


# ----------------------------- kernel ---------------------------------------
def _mqae_kernel(
    nrows_ref,    # (1,) i32 SMEM   number of real (un-padded) rows
    x_ref,        # (Q, T)  f32     original rows, feature-major (rows on lanes)
    mask_ref,     # (1, T)  f32     1.0 where row is masked
    noise_ref,    # (Q, T)  f32     pre-scaled Gaussian masking noise
    w1_ref, b1_ref,   # (P, Q), (P, 1)    -- PyTorch (out, in) layout
    w2_ref, b2_ref,   # (L, P), (L, 1)
    w3_ref, b3_ref,   # (P, L), (P, 1)
    w4_ref, b4_ref,   # (Q, P), (Q, 1)
    recon_ref,    # out (Q, T)   f32   feature-major reconstruction
    latent_ref,   # out (T, L)   bf16  row-major latent (detached metric)
    ssq_ref,      # out (1, 8, 128) f32  per-tile sum of squared error (broadcast)
):
    x = x_ref[...]
    m = mask_ref[...]                      # (1, T) broadcasts over feature rows
    noise = noise_ref[...]

    # masked_x = x*(1-m) + noise*m, rewritten with one fewer VPU mul/add.
    masked_x = x + m * (noise - x)

    # encoder: Linear -> ReLU -> Linear      (H = W @ X + b, feature-major)
    h1 = jnp.dot(w1_ref[...], masked_x, preferred_element_type=jnp.float32) + b1_ref[...]
    h1 = jnp.maximum(h1, 0.0)
    latent = jnp.dot(w2_ref[...], h1, preferred_element_type=jnp.float32) + b2_ref[...]

    # Row-major bf16 latent store: wrapper only needs a free reshape (no XLA
    # transpose pass).  The decoder keeps consuming the f32 feature-major copy.
    latent_ref[...] = latent.T.astype(latent_ref.dtype)

    # decoder: Linear -> ReLU -> Linear
    h2 = jnp.dot(w3_ref[...], latent, preferred_element_type=jnp.float32) + b3_ref[...]
    h2 = jnp.maximum(h2, 0.0)
    recon = jnp.dot(w4_ref[...], h2, preferred_element_type=jnp.float32) + b4_ref[...]
    recon_ref[...] = recon

    # Per-tile partial sum of squared reconstruction error; lane-padding
    # columns are masked in-kernel (no validity stream from HBM).
    t = x.shape[-1]
    col = jax.lax.broadcasted_iota(jnp.int32, (1, t), 1) + pl.program_id(0) * t
    diff = jnp.where(col < nrows_ref[0], recon - x, 0.0)
    ssq_ref[...] = jnp.full(ssq_ref.shape, jnp.sum(diff * diff), dtype=jnp.float32)


# ----------------------------- wrapper ---------------------------------------
@functools.partial(jax.jit, static_argnames=("max_rows_per_tile", "latent_dtype"))
def masked_quantum_autoencoder_fwd(
    x, params, mask=None, noise=None, key=None,
    max_rows_per_tile=DEFAULT_MAX_ROWS_PER_TILE,
    latent_dtype=jnp.bfloat16,
):
    """x: (B, S, Q) f32; mask: (B, S) bool or None; noise: (B, S, Q) f32 or None.

    When mask/noise are None they are generated from `key` (matching the
    module's torch.rand / torch.randn behaviour).  Supplying `noise` gives a
    bit-comparable path against the plain-JAX reference.
    """
    B, S, Q = x.shape
    assert Q == NUM_QUBITS
    N = B * S
    P, L = PROJECTION_DIM, LATENT_DIM

    if (mask is None or noise is None) and key is None:
        raise ValueError("key is required when mask or noise is not provided")
    if mask is None or noise is None:
        k_mask, k_noise = jax.random.split(key)
    if mask is None:
        mask = jax.random.uniform(k_mask, (B, S)) < MASK_RATIO

    # Row tile: biggest that fits comfortably everywhere, multiple of 128 lanes.
    n128 = _round_up(N, 128)
    tile_n = min(_round_up(max_rows_per_tile, 128), n128)
    if tile_n >= n128 and n128 >= 512:
        # Keep >= 2 tiles so the "parallel" axis can feed both v7x TensorCores.
        tile_n = _round_up(n128 // 2, 128)
    n_pad = _round_up(N, tile_n)
    n_tiles = n_pad // tile_n
    pad = n_pad - N

    # Feature-major / lane-dense layout: rows on the 128-lane (last) axis.
    # TODO(synk): fuse this minor-dim-8 transpose into the kernel (lane-dense
    # packed DMA + XLU unswizzle) to save one extra HBM pass over x.
    xT = jnp.pad(x.reshape(N, Q).T.astype(jnp.float32), ((0, 0), (0, pad)))
    maskT = jnp.pad(mask.reshape(1, N).astype(jnp.float32), ((0, 0), (0, pad)))

    if noise is None:
        # Generate directly in the padded feature-major layout (no transpose).
        noiseT = MASK_NOISE_SCALE * jax.random.normal(k_noise, (Q, n_pad), jnp.float32)
    else:
        noiseT = jnp.pad(noise.reshape(N, Q).T.astype(jnp.float32), ((0, 0), (0, pad)))

    nrows = jnp.asarray([N], dtype=jnp.int32)
    w1, b1, w2, b2, w3, b3, w4, b4 = params

    def rows_spec(r):       # row-tiled operand, feature rows on sublanes
        return pl.BlockSpec((r, tile_n), lambda i: (0, i))

    def const_spec(shape):  # VMEM-resident across the whole grid (weights/biases)
        return pl.BlockSpec(shape, lambda i: (0,) * len(shape))

    reconT, latent_rm, ssq = pl.pallas_call(
        _mqae_kernel,
        grid=(n_tiles,),
        in_specs=[
            pl.BlockSpec(memory_space=pltpu.MemorySpace.SMEM),   # nrows scalar
            rows_spec(Q),            # x
            rows_spec(1),            # mask
            rows_spec(Q),            # noise
            const_spec((P, Q)), const_spec((P, 1)),   # W1, b1
            const_spec((L, P)), const_spec((L, 1)),   # W2, b2
            const_spec((P, L)), const_spec((P, 1)),   # W3, b3
            const_spec((Q, P)), const_spec((Q, 1)),   # W4, b4
        ],
        out_specs=(
            rows_spec(Q),                                       # reconstruction
            pl.BlockSpec((tile_n, L), lambda i: (i, 0)),        # latent (row-major)
            pl.BlockSpec((1, 8, 128), lambda i: (i, 0, 0)),     # per-tile sum sq
        ),
        out_shape=(
            jax.ShapeDtypeStruct((Q, n_pad), jnp.float32),
            jax.ShapeDtypeStruct((n_pad, L), latent_dtype),
            jax.ShapeDtypeStruct((n_tiles, 8, 128), jnp.float32),
        ),
        compiler_params=pltpu.CompilerParams(
            dimension_semantics=("parallel",),      # shard row tiles across TCs
            vmem_limit_bytes=64 * 1024 * 1024,
        ),
    )(nrows, xT, maskT, noiseT, w1, b1, w2, b2, w3, b3, w4, b4)

    reconstructed = reconT[:, :N].T.reshape(B, S, Q)
    latent = (latent_rm[:N] if pad else latent_rm).reshape(B, S, L)   # free reshape
    mse = jnp.sum(ssq[:, 0, 0]) / jnp.float32(N * Q)   # mean over real elements

    metrics = {
        "mask": mask,
        "latent": latent,                   # .detach() is a no-op in inference
        "reconstruction_error": mse,        # TODO(synk): .item() host sync left to caller
    }
    return reconstructed, metrics


def init_params(key):
    """Synthetic parameters; PyTorch nn.Linear layout: W (out, in), b (out, 1)."""
    Q, P, L = NUM_QUBITS, PROJECTION_DIM, LATENT_DIM
    ks = jax.random.split(key, 8)
    scale = 0.05
    w1 = scale * jax.random.normal(ks[0], (P, Q), jnp.float32)
    b1 = scale * jax.random.normal(ks[1], (P, 1), jnp.float32)
    w2 = scale * jax.random.normal(ks[2], (L, P), jnp.float32)
    b2 = scale * jax.random.normal(ks[3], (L, 1), jnp.float32)
    w3 = scale * jax.random.normal(ks[4], (P, L), jnp.float32)
    b3 = scale * jax.random.normal(ks[5], (P, 1), jnp.float32)
    w4 = scale * jax.random.normal(ks[6], (Q, P), jnp.float32)
    b4 = scale * jax.random.normal(ks[7], (Q, 1), jnp.float32)
    return (w1, b1, w2, b2, w3, b3, w4, b4)


# ----------------------------- reference (plain JAX) -------------------------
def _reference_fwd(x, mask_bool, noise, params):
    w1, b1, w2, b2, w3, b3, w4, b4 = params
    m = mask_bool[..., None].astype(jnp.float32)
    masked_x = x * (1.0 - m) + noise * m
    h1 = jnp.maximum(masked_x @ w1.T + b1[:, 0], 0.0)
    latent = h1 @ w2.T + b2[:, 0]
    h2 = jnp.maximum(latent @ w3.T + b3[:, 0], 0.0)
    recon = h2 @ w4.T + b4[:, 0]
    mse = jnp.mean((recon - x) ** 2)
    return recon, latent, mse


# ----------------------------- main ------------------------------------------
if __name__ == "__main__":
    key = jax.random.PRNGKey(0)
    k_x, k_mask, k_noise, k_params, k_x2, k_mask2, k_noise2, k_gen = jax.random.split(key, 8)
    params = init_params(k_params)

    # ---- Run A: small shape, external noise -> check vs. reference ---------
    B, S, Q = 2, 8, NUM_QUBITS
    x = jax.random.normal(k_x, (B, S, Q), jnp.float32)
    mask_bool = jax.random.uniform(k_mask, (B, S)) < MASK_RATIO
    noise = jax.random.normal(k_noise, (B, S, Q), jnp.float32) * MASK_NOISE_SCALE

    recon, metrics = masked_quantum_autoencoder_fwd(x, params, mask=mask_bool, noise=noise)
    jax.block_until_ready((recon, metrics["latent"], metrics["reconstruction_error"]))

    ref_recon, ref_latent, ref_mse = _reference_fwd(x, mask_bool, noise, params)
    assert jnp.allclose(recon, ref_recon, atol=1e-4), "recon mismatch (run A)"
    assert jnp.allclose(metrics["latent"].astype(jnp.float32), ref_latent, atol=1e-2), \
        "latent mismatch (run A)"        # latent metric is stored in bf16
    assert jnp.allclose(metrics["reconstruction_error"], ref_mse, atol=1e-4), "mse mismatch (run A)"

    # ---- Run B: multi-tile grid (4 row tiles of 256), check ----------------
    B2, S2 = 4, 256                     # N = 1024 rows
    x2 = jax.random.normal(k_x2, (B2, S2, Q), jnp.float32)
    mask2 = jax.random.uniform(k_mask2, (B2, S2)) < MASK_RATIO
    noise2 = jax.random.normal(k_noise2, (B2, S2, Q), jnp.float32) * MASK_NOISE_SCALE

    recon2, metrics2 = masked_quantum_autoencoder_fwd(
        x2, params, mask=mask2, noise=noise2, max_rows_per_tile=256)
    jax.block_until_ready(recon2)
    ref_recon2, ref_latent2, ref_mse2 = _reference_fwd(x2, mask2, noise2, params)
    assert jnp.allclose(recon2, ref_recon2, atol=1e-4), "recon mismatch (run B)"
    assert jnp.allclose(metrics2["latent"].astype(jnp.float32), ref_latent2, atol=1e-2), \
        "latent mismatch (run B)"
    assert jnp.allclose(metrics2["reconstruction_error"], ref_mse2, atol=1e-4), "mse mismatch (run B)"

    # ---- Run C: wrapper-generated masking noise (module's default path) ----
    recon3, metrics3 = masked_quantum_autoencoder_fwd(x, params, mask=mask_bool, key=k_gen)
    jax.block_until_ready(recon3)
    assert recon3.shape == (B, S, Q)
    assert metrics3["latent"].shape == (B, S, LATENT_DIM)
    assert bool(jnp.isfinite(recon3).all())
    assert bool(jnp.isfinite(metrics3["reconstruction_error"]))
    # Unmasked rows never see any noise, so they must match the reference exactly.
    unmasked = ~mask_bool
    if bool(unmasked.any()):
        assert jnp.allclose(recon3[unmasked], ref_recon[unmasked], atol=1e-4), \
            "unmasked rows mismatch (run C)"

    print("KERNEL_OK")
</pallas_src>

<mosaic_0001>
module attributes {stable_mosaic.version = 11 : i64} {
  func.func @_mqae_kernel(%arg0: i32, %arg1: memref<1xi32, #tpu.memory_space<smem>>, %arg2: memref<8x128xf32, #tpu.memory_space<vmem>>, %arg3: memref<1x128xf32, #tpu.memory_space<vmem>>, %arg4: memref<8x128xf32, #tpu.memory_space<vmem>>, %arg5: memref<128x8xf32, #tpu.memory_space<vmem>>, %arg6: memref<128x1xf32, #tpu.memory_space<vmem>>, %arg7: memref<64x128xf32, #tpu.memory_space<vmem>>, %arg8: memref<64x1xf32, #tpu.memory_space<vmem>>, %arg9: memref<128x64xf32, #tpu.memory_space<vmem>>, %arg10: memref<128x1xf32, #tpu.memory_space<vmem>>, %arg11: memref<8x128xf32, #tpu.memory_space<vmem>>, %arg12: memref<8x1xf32, #tpu.memory_space<vmem>>, %arg13: memref<8x128xf32, #tpu.memory_space<vmem>>, %arg14: memref<128x64xbf16, #tpu.memory_space<vmem>>, %arg15: memref<1x8x128xf32, #tpu.memory_space<vmem>>) attributes {dimension_semantics = [#tpu.dimension_semantics<parallel>], iteration_bounds = array<i64: 1>, scalar_prefetch = 0 : i64, scratch_operands = 0 : i64, tpu.core_type = #tpu.core_type<tc>, window_params = [{transform_indices = @transform_0, window_bounds = array<i64: 1>}, {transform_indices = @transform_1, window_bounds = array<i64: 8, 128>}, {transform_indices = @transform_2, window_bounds = array<i64: 1, 128>}, {transform_indices = @transform_3, window_bounds = array<i64: 8, 128>}, {pipeline_mode = #tpu.pipeline_mode<synchronous>, transform_indices = @transform_4, window_bounds = array<i64: 128, 8>}, {pipeline_mode = #tpu.pipeline_mode<synchronous>, transform_indices = @transform_5, window_bounds = array<i64: 128, 1>}, {pipeline_mode = #tpu.pipeline_mode<synchronous>, transform_indices = @transform_6, window_bounds = array<i64: 64, 128>}, {pipeline_mode = #tpu.pipeline_mode<synchronous>, transform_indices = @transform_7, window_bounds = array<i64: 64, 1>}, {pipeline_mode = #tpu.pipeline_mode<synchronous>, transform_indices = @transform_8, window_bounds = array<i64: 128, 64>}, {pipeline_mode = #tpu.pipeline_mode<synchronous>, transform_indices = @transform_9, window_bounds = array<i64: 128, 1>}, {pipeline_mode = #tpu.pipeline_mode<synchronous>, transform_indices = @transform_10, window_bounds = array<i64: 8, 128>}, {pipeline_mode = #tpu.pipeline_mode<synchronous>, transform_indices = @transform_11, window_bounds = array<i64: 8, 1>}, {transform_indices = @transform_12, window_bounds = array<i64: 8, 128>}, {transform_indices = @transform_13, window_bounds = array<i64: 128, 64>}, {transform_indices = @transform_14, window_bounds = array<i64: 1, 8, 128>}]} {
    %c0 = arith.constant 0 : index
    %c0_0 = arith.constant 0 : index
    %0 = vector.load %arg2[%c0, %c0_0] : memref<8x128xf32, #tpu.memory_space<vmem>>, vector<8x128xf32>
    %c0_1 = arith.constant 0 : index
    %c0_2 = arith.constant 0 : index
    %1 = vector.load %arg3[%c0_1, %c0_2] : memref<1x128xf32, #tpu.memory_space<vmem>>, vector<1x128xf32>
    %c0_3 = arith.constant 0 : index
    %c0_4 = arith.constant 0 : index
    %2 = vector.load %arg4[%c0_3, %c0_4] : memref<8x128xf32, #tpu.memory_space<vmem>>, vector<8x128xf32>
    %3 = arith.subf %2, %0 : vector<8x128xf32>
    %4 = vector.broadcast %1 : vector<1x128xf32> to vector<8x128xf32>
    %5 = arith.mulf %4, %3 : vector<8x128xf32>
    %6 = arith.addf %0, %5 : vector<8x128xf32>
    %c0_5 = arith.constant 0 : index
    %c0_6 = arith.constant 0 : index
    %7 = vector.load %arg5[%c0_5, %c0_6] : memref<128x8xf32, #tpu.memory_space<vmem>>, vector<128x8xf32>
    %cst = arith.constant dense<0.000000e+00> : vector<128x128xf32>
    %8 = tpu.matmul %7, %6, %cst {dimension_numbers = #tpu.dot_dimension_numbers<[1], [0], [0], [1], [0, 0, 1, 1], [], []>} : vector<128x8xf32>, vector<8x128xf32>, vector<128x128xf32> -> vector<128x128xf32>
    %c0_7 = arith.constant 0 : index
    %c0_8 = arith.constant 0 : index
    %9 = vector.load %arg6[%c0_7, %c0_8] : memref<128x1xf32, #tpu.memory_space<vmem>>, vector<128x1xf32>
    %10 = vector.broadcast %9 : vector<128x1xf32> to vector<128x128xf32>
    %11 = arith.addf %8, %10 : vector<128x128xf32>
    %cst_9 = arith.constant 0.000000e+00 : f32
    %12 = vector.broadcast %cst_9 : f32 to vector<128x128xf32>
    %13 = arith.maximumf %11, %12 : vector<128x128xf32>
    %c0_10 = arith.constant 0 : index
    %c0_11 = arith.constant 0 : index
    %14 = vector.load %arg7[%c0_10, %c0_11] : memref<64x128xf32, #tpu.memory_space<vmem>>, vector<64x128xf32>
    %cst_12 = arith.constant dense<0.000000e+00> : vector<64x128xf32>
    %15 = tpu.matmul %14, %13, %cst_12 {dimension_numbers = #tpu.dot_dimension_numbers<[1], [0], [0], [1], [0, 0, 1, 1], [], []>} : vector<64x128xf32>, vector<128x128xf32>, vector<64x128xf32> -> vector<64x128xf32>
    %c0_13 = arith.constant 0 : index
    %c0_14 = arith.constant 0 : index
    %16 = vector.load %arg8[%c0_13, %c0_14] : memref<64x1xf32, #tpu.memory_space<vmem>>, vector<64x1xf32>
    %17 = vector.broadcast %16 : vector<64x1xf32> to vector<64x128xf32>
    %18 = arith.addf %15, %17 : vector<64x128xf32>
    %19 = tpu.transpose %18, [1, 0] : vector<64x128xf32> -> vector<128x64xf32>
    %20 = arith.truncf %19 : vector<128x64xf32> to vector<128x64xbf16>
    %c0_15 = arith.constant 0 : index
    %c0_16 = arith.constant 0 : index
    %21 = vector.load %arg14[%c0_15, %c0_16] : memref<128x64xbf16, #tpu.memory_space<vmem>>, vector<128x64xbf16>
    tpu.vector_store %arg14[%c0_15, %c0_16], %20 {strides = array<i32>} : memref<128x64xbf16, #tpu.memory_space<vmem>>, vector<128x64xbf16>,
    %c0_17 = arith.constant 0 : index
    %c0_18 = arith.constant 0 : index
    %22 = vector.load %arg9[%c0_17, %c0_18] : memref<128x64xf32, #tpu.memory_space<vmem>>, vector<128x64xf32>
    %cst_19 = arith.constant dense<0.000000e+00> : vector<128x128xf32>
    %23 = tpu.matmul %22, %18, %cst_19 {dimension_numbers = #tpu.dot_dimension_numbers<[1], [0], [0], [1], [0, 0, 1, 1], [], []>} : vector<128x64xf32>, vector<64x128xf32>, vector<128x128xf32> -> vector<128x128xf32>
    %c0_20 = arith.constant 0 : index
    %c0_21 = arith.constant 0 : index
    %24 = vector.load %arg10[%c0_20, %c0_21] : memref<128x1xf32, #tpu.memory_space<vmem>>, vector<128x1xf32>
    %25 = vector.broadcast %24 : vector<128x1xf32> to vector<128x128xf32>
    %26 = arith.addf %23, %25 : vector<128x128xf32>
    %cst_22 = arith.constant 0.000000e+00 : f32
    %27 = vector.broadcast %cst_22 : f32 to vector<128x128xf32>
    %28 = arith.maximumf %26, %27 : vector<128x128xf32>
    %c0_23 = arith.constant 0 : index
    %c0_24 = arith.constant 0 : index
    %29 = vector.load %arg11[%c0_23, %c0_24] : memref<8x128xf32, #tpu.memory_space<vmem>>, vector<8x128xf32>
    %cst_25 = arith.constant dense<0.000000e+00> : vector<8x128xf32>
    %30 = tpu.matmul %29, %28, %cst_25 {dimension_numbers = #tpu.dot_dimension_numbers<[1], [0], [0], [1], [0, 0, 1, 1], [], []>} : vector<8x128xf32>, vector<128x128xf32>, vector<8x128xf32> -> vector<8x128xf32>
    %c0_26 = arith.constant 0 : index
    %c0_27 = arith.constant 0 : index
    %31 = vector.load %arg12[%c0_26, %c0_27] : memref<8x1xf32, #tpu.memory_space<vmem>>, vector<8x1xf32>
    %32 = vector.broadcast %31 : vector<8x1xf32> to vector<8x128xf32>
    %33 = arith.addf %30, %32 : vector<8x128xf32>
    %c0_28 = arith.constant 0 : index
    %c0_29 = arith.constant 0 : index
    %34 = vector.load %arg13[%c0_28, %c0_29] : memref<8x128xf32, #tpu.memory_space<vmem>>, vector<8x128xf32>
    tpu.vector_store %arg13[%c0_28, %c0_29], %33 {strides = array<i32>} : memref<8x128xf32, #tpu.memory_space<vmem>>, vector<8x128xf32>,
    %35 = tpu.iota {dimensions = array<i32: 1>} : vector<1x128xi32>
    %c128_i32 = arith.constant 128 : i32
    %36 = arith.muli %arg0, %c128_i32 : i32
    %37 = vector.broadcast %36 : i32 to vector<1x128xi32>
    %38 = arith.addi %35, %37 : vector<1x128xi32>
    %c0_30 = arith.constant 0 : index
    %39 = memref.load %arg1[%c0_30] : memref<1xi32, #tpu.memory_space<smem>>
    %40 = vector.broadcast %39 : i32 to vector<1x128xi32>
    %41 = arith.cmpi slt, %38, %40 : vector<1x128xi32>
    %42 = arith.subf %33, %0 : vector<8x128xf32>
    %cst_31 = arith.constant 0.000000e+00 : f32
    %43 = vector.shape_cast %41 : vector<1x128xi1> to vector<1x128xi1>
    %44 = vector.broadcast %43 : vector<1x128xi1> to vector<8x128xi1>
    %45 = vector.broadcast %cst_31 : f32 to vector<8x128xf32>
    %46 = arith.select %44, %42, %45 : vector<8x128xi1>, vector<8x128xf32>
    %47 = arith.mulf %46, %46 : vector<8x128xf32>
    %48 = vector.shape_cast %47 : vector<8x128xf32> to vector<1x8x128xf32>
    %cst_32 = arith.constant dense<0.000000e+00> : vector<1xf32>
    %49 = vector.multi_reduction <add>, %48, %cst_32 [1, 2] : vector<1x8x128xf32> to vector<1xf32>
    %50 = vector.shape_cast %49 : vector<1xf32> to vector<1x1x1xf32>
    %51 = vector.extract %50[0, 0, 0] : f32 from vector<1x1x1xf32>
    %52 = vector.broadcast %51 : f32 to vector<1x8x128xf32>
    %c0_33 = arith.constant 0 : index
    %c0_34 = arith.constant 0 : index
    %c0_35 = arith.constant 0 : index
    %53 = vector.load %arg15[%c0_33, %c0_34, %c0_35] : memref<1x8x128xf32, #tpu.memory_space<vmem>>, vector<1x8x128xf32>
    tpu.vector_store %arg15[%c0_33, %c0_34, %c0_35], %52 {strides = array<i32>} : memref<1x8x128xf32, #tpu.memory_space<vmem>>, vector<1x8x128xf32>,
    return
  }
  func.func @transform_0(%arg0: i32) -> i32 {
    %c0_i32 = arith.constant 0 : i32
    %c0_i32_0 = arith.constant 0 : i32
    return %c0_i32 : i32
  }
  func.func @transform_1(%arg0: i32) -> (i32, i32) {
    %c0_i32 = arith.constant 0 : i32
    %c0_i32_0 = arith.constant 0 : i32
    return %c0_i32, %arg0 : i32, i32
  }
  func.func @transform_2(%arg0: i32) -> (i32, i32) {
    %c0_i32 = arith.constant 0 : i32
    %c0_i32_0 = arith.constant 0 : i32
    return %c0_i32, %arg0 : i32, i32
  }
  func.func @transform_3(%arg0: i32) -> (i32, i32) {
    %c0_i32 = arith.constant 0 : i32
    %c0_i32_0 = arith.constant 0 : i32
    return %c0_i32, %arg0 : i32, i32
  }
  func.func @transform_4(%arg0: i32) -> (i32, i32) {
    %c0_i32 = arith.constant 0 : i32
    %c0_i32_0 = arith.constant 0 : i32
    %c0_i32_1 = arith.constant 0 : i32
    return %c0_i32, %c0_i32_0 : i32, i32
  }
  func.func @transform_5(%arg0: i32) -> (i32, i32) {
    %c0_i32 = arith.constant 0 : i32
    %c0_i32_0 = arith.constant 0 : i32
    %c0_i32_1 = arith.constant 0 : i32
    return %c0_i32, %c0_i32_0 : i32, i32
  }
  func.func @transform_6(%arg0: i32) -> (i32, i32) {
    %c0_i32 = arith.constant 0 : i32
    %c0_i32_0 = arith.constant 0 : i32
    %c0_i32_1 = arith.constant 0 : i32
    return %c0_i32, %c0_i32_0 : i32, i32
  }
  func.func @transform_7(%arg0: i32) -> (i32, i32) {
    %c0_i32 = arith.constant 0 : i32
    %c0_i32_0 = arith.constant 0 : i32
    %c0_i32_1 = arith.constant 0 : i32
    return %c0_i32, %c0_i32_0 : i32, i32
  }
  func.func @transform_8(%arg0: i32) -> (i32, i32) {
    %c0_i32 = arith.constant 0 : i32
    %c0_i32_0 = arith.constant 0 : i32
    %c0_i32_1 = arith.constant 0 : i32
    return %c0_i32, %c0_i32_0 : i32, i32
  }
  func.func @transform_9(%arg0: i32) -> (i32, i32) {
    %c0_i32 = arith.constant 0 : i32
    %c0_i32_0 = arith.constant 0 : i32
    %c0_i32_1 = arith.constant 0 : i32
    return %c0_i32, %c0_i32_0 : i32, i32
  }
  func.func @transform_10(%arg0: i32) -> (i32, i32) {
    %c0_i32 = arith.constant 0 : i32
    %c0_i32_0 = arith.constant 0 : i32
    %c0_i32_1 = arith.constant 0 : i32
    return %c0_i32, %c0_i32_0 : i32, i32
  }
  func.func @transform_11(%arg0: i32) -> (i32, i32) {
    %c0_i32 = arith.constant 0 : i32
    %c0_i32_0 = arith.constant 0 : i32
    %c0_i32_1 = arith.constant 0 : i32
    return %c0_i32, %c0_i32_0 : i32, i32
  }
  func.func @transform_12(%arg0: i32) -> (i32, i32) {
    %c0_i32 = arith.constant 0 : i32
    %c0_i32_0 = arith.constant 0 : i32
    return %c0_i32, %arg0 : i32, i32
  }
  func.func @transform_13(%arg0: i32) -> (i32, i32) {
    %c0_i32 = arith.constant 0 : i32
    %c0_i32_0 = arith.constant 0 : i32
    return %arg0, %c0_i32 : i32, i32
  }
  func.func @transform_14(%arg0: i32) -> (i32, i32, i32) {
    %c0_i32 = arith.constant 0 : i32
    %c0_i32_0 = arith.constant 0 : i32
    %c0_i32_1 = arith.constant 0 : i32
    return %arg0, %c0_i32, %c0_i32_0 : i32, i32, i32
  }
}

</mosaic_0001>

<bundles_post_ra>
// kernel: masked_quantum_autoencoder_fwd.1
= control target key start
LH: loop header
LB: loop body
LE: loop exit
PB: predicated region body
PF: predicated region fallthrough
CT: control target
= control target key end

     0   :  { %21 = vsyncpa [#allocation4], 0  ;;  %s2356_s0 = inlined_call_operand.<no memory space> [shape: s32[1], index: 0, kind: input, shape index: {}]   ;;  %s2357_s1 = inlined_call_operand.hbm [shape: f32[8,128], index: 1, kind: input, shape index: {}]   ;;  %s2358_s2 = inlined_call_operand.hbm [shape: f32[1,128], index: 2, kind: input, shape index: {}]   ;;  %s2359_s3 = inlined_call_operand.hbm [shape: f32[8,128], index: 3, kind: input, shape index: {}]   ;;  %s2360_s4 = inlined_call_operand.hbm [shape: f32[128,8], index: 4, kind: input, shape index: {}]   ;;  %s2361_s5 = inlined_call_operand.hbm [shape: f32[128,1], index: 5, kind: input, shape index: {}]   ;;  %s2362_s6 = inlined_call_operand.hbm [shape: f32[64,128], index: 6, kind: input, shape index: {}]   ;;  %s2363_s7 = inlined_call_operand.hbm [shape: f32[64,1], index: 7, kind: input, shape index: {}]   ;;  %s2364_s8 = inlined_call_operand.hbm [shape: f32[128,64], index: 8, kind: input, shape index: {}]   ;;  %s2365_s9 = inlined_call_operand.hbm [shape: f32[128,1], index: 9, kind: input, shape index: {}]   ;;  %s2366_s10 = inlined_call_operand.hbm [shape: f32[8,128], index: 10, kind: input, shape index: {}]   ;;  %s2367_s11 = inlined_call_operand.hbm [shape: f32[8,1], index: 11, kind: input, shape index: {}]   ;;  %s2368_s12 = inlined_call_operand.hbm [shape: f32[8,128], index: 12, kind: output, shape index: {0}]   ;;  %s2369_s13 = inlined_call_operand.hbm [shape: bf16[128,64], index: 13, kind: output, shape index: {1}]   ;;  %s2370_s14 = inlined_call_operand.hbm [shape: f32[1,8,128], index: 14, kind: output, shape index: {2}]  }
   0x1   :  { %22 = vsyncpa [#allocation7], 0 }
   0x2   :  { %23 = vsyncpa [#allocation10], 0 }
   0x3   :  { %24 = vsyncpa [#allocation13], 0 }
   0x4   :  { %25 = vsyncpa [#allocation16], 0 }
   0x5   :  { %26 = vsyncpa [#allocation19], 0 }
   0x6   :  { %27 = vsyncpa [#allocation5], 0 }
   0x7   :  { %28 = vsyncpa [#allocation23], 0  ;;  %s1981_s29 = smov [#allocation6]   ;;  %s1982_s15 = smov [#allocation9]  }
   0x8   :  { %s47_s30 = sshll.u32 %s1981_s29, 4  ;;  %s66_s16 = sshll.u32 %s1982_s15, 4  ;;  %s48_s30 = int_to_ptr.vmem [resolvable:$true] %s47_s30  ;;  %s2078_s16 = int_to_ptr.vmem [resolvable:$true] %s66_s16 }
   0x9   :  { %s1657_s19 = scalar_lea.hbm %s2358_s2, 16 }
   0xa   :  { %p1658_p0 = scmp.ne.s32.totalorder %s2358_s2, %s1657_s19  ;;  %p1661_p1 = scmp.lt.u32.totalorder %s1657_s19, %s2358_s2 }
   0xc   :  { %p1663_p2 = pnand %p1661_p1, %p1658_p0 }
   0xe   :  { %1666 = shalt.err (!%p1663_p2)
}
   0xf   :  { %s1667_s24 = scalar_lea.vmem %s48_s30, 16  ;;  %s1671_s25 = scalar_lea.vmem %s48_s30, 32 }
  0x10   :  { %p1668_p3 = scmp.ne.s32.totalorder %s48_s30, %s1667_s24  ;;  %p1672_p4 = scmp.lt.s32.totalorder %s48_s30, %s48_s30 }
  0x11   :  { %p1673_p5 = scmp.lt.s32.totalorder %s1671_s25, %s1667_s24 }
  0x13   :  { %p1674_p6 = por %p1673_p5, %p1672_p4 }
  0x15   :  { %p1675_p7 = pnand %p1674_p6, %p1668_p3 }
  0x17   :  { %1678 = shalt.err (!%p1675_p7)
}
  0x18   :  { %50 = dma.hbm_to_vmem [thread:$0]  %s2358_s2, 16, %s48_s30, [#allocation7]  }
  0x19   :  { %s1679_s15 = scalar_lea.hbm %s2360_s4, 2048 }
  0x1a   :  { %p1680_p8 = scmp.ne.s32.totalorder %s2360_s4, %s1679_s15  ;;  %p1683_p9 = scmp.lt.u32.totalorder %s1679_s15, %s2360_s4 }
  0x1c   :  { %p1685_p10 = pnand %p1683_p9, %p1680_p8 }
  0x1e   :  { %1688 = shalt.err (!%p1685_p10)
}
  0x1f   :  { %s1689_s21 = scalar_lea.vmem %s2078_s16, 2048  ;;  %p1694_p12 = scmp.lt.s32.totalorder %s2078_s16, %s2078_s16 }
  0x20   :  { %p1690_p11 = scmp.ne.s32.totalorder %s2078_s16, %s1689_s21  ;;  %p1695_p13 = scmp.lt.s32.totalorder %s1689_s21, %s1689_s21 }
  0x22   :  { %p1696_p0 = por %p1695_p13, %p1694_p12 }
  0x24   :  { %p1697_p1 = pnand %p1696_p0, %p1690_p11 }
  0x26   :  { %1700 = shalt.err (!%p1697_p1)
}
  0x27   :  { %s1983_s2 = smov 128   ;;  %s1984_s30 = smov 8  }
  0x28   :  { %72 = dma.hbm_to_vmem [thread:$0]  %s2360_s4, 2048, %s2078_s16, [#allocation10], %s1983_s2, %s1983_s2, %s1984_s30  }
  0x29   :  { %s1985_s24 = smov [#allocation12]   ;;  %s1986_s26 = smov [#allocation15]  }
  0x2a   :  { %s90_s25 = sshll.u32 %s1985_s24, 4  ;;  %s114_s27 = sshll.u32 %s1986_s26, 4  ;;  %s91_s25 = int_to_ptr.vmem [resolvable:$true] %s90_s25  ;;  %s2112_s27 = int_to_ptr.vmem [resolvable:$true] %s114_s27 }
  0x2b   :  { %s1701_s15 = scalar_lea.hbm %s2362_s6, 1024 }
  0x2c   :  { %p1702_p2 = scmp.ne.s32.totalorder %s2362_s6, %s1701_s15  ;;  %p1705_p3 = scmp.lt.u32.totalorder %s1701_s15, %s2362_s6 }
  0x2e   :  { %p1707_p4 = pnand %p1705_p3, %p1702_p2 }
  0x30   :  { %1710 = shalt.err (!%p1707_p4)
}
  0x31   :  { %s1711_s4 = scalar_lea.vmem %s91_s25, 1024  ;;  %p1716_p6 = scmp.lt.s32.totalorder %s91_s25, %s91_s25 }
  0x32   :  { %p1712_p5 = scmp.ne.s32.totalorder %s91_s25, %s1711_s4  ;;  %p1717_p7 = scmp.lt.s32.totalorder %s1711_s4, %s1711_s4 }
  0x34   :  { %p1718_p8 = por %p1717_p7, %p1716_p6 }
  0x36   :  { %p1719_p9 = pnand %p1718_p8, %p1712_p5 }
  0x38   :  { %1722 = shalt.err (!%p1719_p9)
}
  0x39   :  { %96 = dma.hbm_to_vmem [thread:$0]  %s2362_s6, 1024, %s91_s25, [#allocation13], %s1983_s2, %s1983_s2, %s1984_s30  }
  0x3a   :  { %s1723_s24 = scalar_lea.hbm %s2364_s8, 2048 }
  0x3b   :  { %p1724_p10 = scmp.ne.s32.totalorder %s2364_s8, %s1723_s24  ;;  %p1727_p11 = scmp.lt.u32.totalorder %s1723_s24, %s2364_s8 }
  0x3d   :  { %p1729_p12 = pnand %p1727_p11, %p1724_p10 }
  0x3f   :  { %1732 = shalt.err (!%p1729_p12)
}
  0x40   :  { %s1733_s17 = scalar_lea.vmem %s2112_s27, 2048  ;;  %p1738_p0 = scmp.lt.s32.totalorder %s2112_s27, %s2112_s27 }
  0x41   :  { %p1734_p13 = scmp.ne.s32.totalorder %s2112_s27, %s1733_s17  ;;  %p1739_p1 = scmp.lt.s32.totalorder %s1733_s17, %s1733_s17 }
  0x43   :  { %p1740_p2 = por %p1739_p1, %p1738_p0 }
  0x45   :  { %p1741_p3 = pnand %p1740_p2, %p1734_p13 }
  0x47   :  { %1744 = shalt.err (!%p1741_p3)
}
  0x48   :  { %120 = dma.hbm_to_vmem [thread:$0]  %s2364_s8, 2048, %s2112_s27, [#allocation16], %s1983_s2, %s1983_s2, %s1984_s30  }
  0x49   :  { %s1987_s18 = smov [#allocation18]   ;;  %s1988_s20 = smov [#allocation3]  }
  0x4a   :  { %s139_s19 = sshll.u32 %s1987_s18, 4  ;;  %s37_s4 = sshll.u32 %s1988_s20, 4  ;;  %s140_s19 = int_to_ptr.vmem [resolvable:$true] %s139_s19  ;;  %s38_s4 = int_to_ptr.vmem [resolvable:$true] %s37_s4 }
  0x4b   :  { %s1745_s22 = scalar_lea.hbm %s2366_s10, 128 }
  0x4c   :  { %p1746_p4 = scmp.ne.s32.totalorder %s2366_s10, %s1745_s22  ;;  %p1749_p5 = scmp.lt.u32.totalorder %s1745_s22, %s2366_s10 }
  0x4e   :  { %p1751_p6 = pnand %p1749_p5, %p1746_p4 }
  0x50   :  { %1754 = shalt.err (!%p1751_p6)
}
  0x51   :  { %s1755_s8 = scalar_lea.vmem %s140_s19, 128  ;;  %p1760_p8 = scmp.lt.s32.totalorder %s140_s19, %s140_s19 }
  0x52   :  { %p1756_p7 = scmp.ne.s32.totalorder %s140_s19, %s1755_s8  ;;  %p1761_p9 = scmp.lt.s32.totalorder %s1755_s8, %s1755_s8 }
  0x54   :  { %p1762_p10 = por %p1761_p9, %p1760_p8 }
  0x56   :  { %p1763_p11 = pnand %p1762_p10, %p1756_p7 }
  0x58   :  { %1766 = shalt.err (!%p1763_p11)
}
  0x59   :  { %142 = dma.hbm_to_vmem [thread:$0]  %s2366_s10, 128, %s140_s19, [#allocation19]  }
  0x5a   :  { %s1767_s6 = scalar_lea.hbm %s2357_s1, 128 }
  0x5b   :  { %p1768_p12 = scmp.ne.s32.totalorder %s2357_s1, %s1767_s6  ;;  %p1771_p13 = scmp.lt.u32.totalorder %s1767_s6, %s2357_s1 }
  0x5d   :  { %p1773_p0 = pnand %p1771_p13, %p1768_p12 }
  0x5f   :  { %1776 = shalt.err (!%p1773_p0)
}
  0x60   :  { %s1777_s21 = scalar_lea.vmem %s38_s4, 128  ;;  %p1782_p2 = scmp.lt.s32.totalorder %s38_s4, %s38_s4 }
  0x61   :  { %p1778_p1 = scmp.ne.s32.totalorder %s38_s4, %s1777_s21  ;;  %p1783_p3 = scmp.lt.s32.totalorder %s1777_s21, %s1777_s21 }
  0x63   :  { %p1784_p4 = por %p1783_p3, %p1782_p2 }
  0x65   :  { %p1785_p5 = pnand %p1784_p4, %p1778_p1 }
  0x67   :  { %1788 = shalt.err (!%p1785_p5)
}
  0x68   :  { %40 = dma.hbm_to_vmem [thread:$0]  %s2357_s1, 128, %s38_s4, [#allocation4]  }
  0x69   :  { %s1989_s22 = smov [#allocation8]   ;;  %s1990_s24 = smov [#allocation11]  }
  0x6a   :  { %s57_s23 = sshll.u32 %s1989_s22, 4  ;;  %s78_s26 = sshll.u32 %s1990_s24, 4  ;;  %s58_s23 = int_to_ptr.vmem [resolvable:$true] %s57_s23  ;;  %s2173_s26 = int_to_ptr.vmem [resolvable:$true] %s78_s26 }
  0x6b   :  { %s1789_s27 = scalar_lea.hbm %s2359_s3, 128 }
  0x6c   :  { %p1790_p6 = scmp.ne.s32.totalorder %s2359_s3, %s1789_s27  ;;  %p1793_p7 = scmp.lt.u32.totalorder %s1789_s27, %s2359_s3 }
  0x6e   :  { %p1795_p8 = pnand %p1793_p7, %p1790_p6 }
  0x70   :  { %1798 = shalt.err (!%p1795_p8)
}
  0x71   :  { %s1799_s1 = scalar_lea.vmem %s58_s23, 128  ;;  %p1804_p10 = scmp.lt.s32.totalorder %s58_s23, %s58_s23 }
  0x72   :  { %p1800_p9 = scmp.ne.s32.totalorder %s58_s23, %s1799_s1  ;;  %p1805_p11 = scmp.lt.s32.totalorder %s1799_s1, %s1799_s1 }
  0x74   :  { %p1806_p12 = por %p1805_p11, %p1804_p10 }
  0x76   :  { %p1807_p13 = pnand %p1806_p12, %p1800_p9 }
  0x78   :  { %1810 = shalt.err (!%p1807_p13)
}
  0x79   :  { %60 = dma.hbm_to_vmem [thread:$0]  %s2359_s3, 128, %s58_s23, [#allocation7]  }
  0x7a   :  { %s1811_s16 = scalar_lea.hbm %s2361_s5, 2048 }
  0x7b   :  { %p1812_p0 = scmp.ne.s32.totalorder %s2361_s5, %s1811_s16  ;;  %p1815_p1 = scmp.lt.u32.totalorder %s1811_s16, %s2361_s5 }
  0x7d   :  { %p1817_p2 = pnand %p1815_p1, %p1812_p0 }
  0x7f   :  { %1820 = shalt.err (!%p1817_p2)
}
  0x80   :  { %s1821_s24 = scalar_lea.vmem %s2173_s26, 2048  ;;  %p1826_p4 = scmp.lt.s32.totalorder %s2173_s26, %s2173_s26 }
  0x81   :  { %p1822_p3 = scmp.ne.s32.totalorder %s2173_s26, %s1821_s24  ;;  %p1827_p5 = scmp.lt.s32.totalorder %s1821_s24, %s1821_s24 }
  0x83   :  { %p1828_p6 = por %p1827_p5, %p1826_p4 }
  0x85   :  { %p1829_p7 = pnand %p1828_p6, %p1822_p3 }
  0x87   :  { %1832 = shalt.err (!%p1829_p7)
}
  0x88   :  { %84 = dma.hbm_to_vmem [thread:$0]  %s2361_s5, 2048, %s2173_s26, [#allocation10], %s1983_s2, %s1983_s2, %s1984_s30  }
  0x89   :  { %s1991_s28 = smov [#allocation14]   ;;  %s1992_s27 = smov [#allocation17]  }
  0x8a   :  { %s102_s8 = sshll.u32 %s1991_s28, 4  ;;  %s126_s29 = sshll.u32 %s1992_s27, 4  ;;  %s103_s8 = int_to_ptr.vmem [resolvable:$true] %s102_s8  ;;  %s2207_s29 = int_to_ptr.vmem [resolvable:$true] %s126_s29 }
  0x8b   :  { %s1833_s6 = scalar_lea.hbm %s2363_s7, 1024 }
  0x8c   :  { %p1834_p8 = scmp.ne.s32.totalorder %s2363_s7, %s1833_s6  ;;  %p1837_p9 = scmp.lt.u32.totalorder %s1833_s6, %s2363_s7 }
  0x8e   :  { %p1839_p10 = pnand %p1837_p9, %p1834_p8 }
  0x90   :  { %1842 = shalt.err (!%p1839_p10)
}
  0x91   :  { %s1843_s5 = scalar_lea.vmem %s103_s8, 1024  ;;  %p1848_p12 = scmp.lt.s32.totalorder %s103_s8, %s103_s8 }
  0x92   :  { %p1844_p11 = scmp.ne.s32.totalorder %s103_s8, %s1843_s5  ;;  %p1849_p13 = scmp.lt.s32.totalorder %s1843_s5, %s1843_s5 }
  0x94   :  { %p1850_p0 = por %p1849_p13, %p1848_p12 }
  0x96   :  { %p1851_p1 = pnand %p1850_p0, %p1844_p11 }
  0x98   :  { %1854 = shalt.err (!%p1851_p1)
}
  0x99   :  { %108 = dma.hbm_to_vmem [thread:$0]  %s2363_s7, 1024, %s103_s8, [#allocation13], %s1983_s2, %s1983_s2, %s1984_s30  }
  0x9a   :  { %s1855_s10 = scalar_lea.hbm %s2365_s9, 2048 }
  0x9b   :  { %p1856_p2 = scmp.ne.s32.totalorder %s2365_s9, %s1855_s10  ;;  %p1859_p3 = scmp.lt.u32.totalorder %s1855_s10, %s2365_s9 }
  0x9d   :  { %p1861_p4 = pnand %p1859_p3, %p1856_p2 }
  0x9f   :  { %1864 = shalt.err (!%p1861_p4)
}
  0xa0   :  { %s1865_s23 = scalar_lea.vmem %s2207_s29, 2048  ;;  %p1870_p6 = scmp.lt.s32.totalorder %s2207_s29, %s2207_s29 }
  0xa1   :  { %p1866_p5 = scmp.ne.s32.totalorder %s2207_s29, %s1865_s23  ;;  %p1871_p7 = scmp.lt.s32.totalorder %s1865_s23, %s1865_s23 }
  0xa3   :  { %p1872_p8 = por %p1871_p7, %p1870_p6 }
  0xa5   :  { %p1873_p9 = pnand %p1872_p8, %p1866_p5 }
  0xa7   :  { %1876 = shalt.err (!%p1873_p9)
}
  0xa8   :  { %132 = dma.hbm_to_vmem [thread:$0]  %s2365_s9, 2048, %s2207_s29, [#allocation16], %s1983_s2, %s1983_s2, %s1984_s30  }
  0xa9   :  { %s1993_s8 = smov [#allocation20]   ;;  %s1877_s6 = scalar_lea.hbm %s2367_s11, 128 }
  0xaa   :  { %s149_s27 = sshll.u32 %s1993_s8, 4  ;;  %p1878_p10 = scmp.ne.s32.totalorder %s2367_s11, %s1877_s6  ;;  %s150_s27 = int_to_ptr.vmem [resolvable:$true] %s149_s27 }
  0xab   :  { %p1881_p11 = scmp.lt.u32.totalorder %s1877_s6, %s2367_s11 }
  0xad   :  { %p1883_p12 = pnand %p1881_p11, %p1878_p10 }
  0xaf   :  { %1886 = shalt.err (!%p1883_p12)
}
  0xb0   :  { %s1887_s5 = scalar_lea.vmem %s150_s27, 128  ;;  %p1892_p0 = scmp.lt.s32.totalorder %s150_s27, %s150_s27 }
  0xb1   :  { %p1888_p13 = scmp.ne.s32.totalorder %s150_s27, %s1887_s5  ;;  %p1893_p1 = scmp.lt.s32.totalorder %s1887_s5, %s1887_s5 }
  0xb3   :  { %p1894_p2 = por %p1893_p1, %p1892_p0 }
  0xb5   :  { %p1895_p3 = pnand %p1894_p2, %p1888_p13 }
  0xb7   :  { %1898 = shalt.err (!%p1895_p3)
}
  0xb8   :  { %152 = dma.hbm_to_vmem [thread:$0]  %s2367_s11, 128, %s150_s27, [#allocation19]  }
  0xb9   :  { %1965 = dma.done.wait [#allocation4], 128  }
  0xba   :  { %1966 = vsyncadd [#allocation4], 4294967168 }
  0xbb   :  { %1967 = dma.done.wait [#allocation7], 144  }
  0xbc   :  { %1968 = vsyncadd [#allocation7], 4294967152 }
  0xbd   :  { %1969 = dma.done.wait [#allocation10], 4096  }
  0xbe   :  { %1970 = vsyncadd [#allocation10], 4294963200 }
  0xbf   :  { %1971 = dma.done.wait [#allocation13], 2048  }
  0xc0   :  { %1972 = vsyncadd [#allocation13], 4294965248 }
  0xc1   :  { %1973 = dma.done.wait [#allocation16], 4096  }
  0xc2   :  { %1974 = vsyncadd [#allocation16], 4294963200 }
  0xc3   :  { %1975 = dma.done.wait [#allocation19], 256  }
  0xc4   :  { %1976 = vsyncadd [#allocation19], 4294967040  ;;  %v1994_v0 = vmov 0   ;;  %vm310_vm0 = vcmask 64512   ;;  %v2256_v1 = vld [vmem:[#allocation3] sm:$0xff]  ;;  %v188_v3 = vld [vmem:[#allocation8] sm:$0xff] }
  0xc5   :  { %1655 = vset.pattern.permute.xlu0 %v1994_v0  ;;  %1656 = vset.pattern.permute.xlu1 %v1994_v0  ;;  %v1267_v2 = vld [vmem:[#allocation6] ss:$0 sm:$0xff]  ;;  %v189_v4 = vsub.f32 %v188_v3, %v2256_v1  ;;  %v198_v5 = vld [vmem:[#allocation9] sm:$0xff]  ;;  %v215_v8 = vld [vmem:[#allocation11 + $0x8] sm:$0xff]  ;;  %vm906_vm1 = vcmask 523264   ;;  %vm1996_vm2 = vmmov 0  }
  0xc6   :  { %v214_v6 = vld [vmem:[#allocation11] sm:$0xff]  ;;  %1416 = vmatprep.mubr.msk.f32.mxu0 %vm310_vm0, %v198_v5  ;;  %v216_v9 = vld [vmem:[#allocation11 + $0x10] sm:$0xff]  ;;  %v217_v11 = vld [vmem:[#allocation11 + $0x18] sm:$0xff]  ;;  %vm777_vm4 = vcmask 519168   ;;  %s1999_s26 = smov [#allocation21]  }
  0xc7   :  { %232 = vperm.xlu0 %1655, %v214_v6   ;;  %v196_v7 = vmul.f32 %v1267_v2, %v189_v4  ;;  %242 = vperm.xlu1 %1656, %v216_v9   ;;  %v199_v12 = vld [vmem:[#allocation9 + $0x8] sm:$0xff]  ;;  %v200_v13 = vld [vmem:[#allocation9 + $0x10] sm:$0xff]  ;;  %v218_v14 = vld [vmem:[#allocation11 + $0x20] sm:$0xff]  ;;  %s1224_s20 = sshll.u32 %s1999_s26, 4  ;;  %s1225_s20 = int_to_ptr.vmem [resolvable:$true] %s1224_s20 }
  0xc8   :  { %v219_v15 = vld [vmem:[#allocation11 + $0x28] sm:$0xff]  ;;  %v201_v16 = vld [vmem:[#allocation9 + $0x18] sm:$0xff]  ;;  %v202_v17 = vld [vmem:[#allocation9 + $0x20] sm:$0xff] }
  0xc9   :  { %v197_v10 = vadd.f32 %v196_v7, %v2256_v1  ;;  %v220_v18 = vld [vmem:[#allocation11 + $0x30] sm:$0xff]  ;;  %v221_v19 = vld [vmem:[#allocation11 + $0x38] sm:$0xff]  ;;  %v203_v20 = vld [vmem:[#allocation9 + $0x28] sm:$0xff] }
  0xca   :  { %v204_v21 = vld [vmem:[#allocation9 + $0x30] sm:$0xff]  ;;  %v222_v22 = vld [vmem:[#allocation11 + $0x40] sm:$0xff]  ;;  %v223_v23 = vld [vmem:[#allocation11 + $0x48] sm:$0xff] }
  0xcb   :  { %237 = vperm.xlu0 %1655, %v215_v8   ;;  %1414 = vmatprep.subr.mxu0 %v197_v10  ;;  %v205_v24 = vld [vmem:[#allocation9 + $0x38] sm:$0xff]  ;;  %v206_v25 = vld [vmem:[#allocation9 + $0x40] sm:$0xff]  ;;  %v224_v26 = vld [vmem:[#allocation11 + $0x50] sm:$0xff] }
  0xcc   :  { %1415 = vmatpush3.msra.mxu0 %v197_v10  ;;  %247 = vperm.xlu1 %1656, %v217_v11   ;;  %v225_v27 = vld [vmem:[#allocation11 + $0x58] sm:$0xff]  ;;  %v207_v28 = vld [vmem:[#allocation9 + $0x48] sm:$0xff]  ;;  %v208_v29 = vld [vmem:[#allocation9 + $0x50] sm:$0xff] }
  0xcd   :  { %1417 = vmatmul.mubr.msk.f32.vlgmr.msra.gmra.mrb[0].mxu0 %vm310_vm0, %v199_v12  ;;  %v226_v30 = vld [vmem:[#allocation11 + $0x60] sm:$0xff]  ;;  %v227_v31 = vld [vmem:[#allocation11 + $0x68] sm:$0xff]  ;;  %v209_v32 = vld [vmem:[#allocation9 + $0x58] sm:$0xff] }
  0xce   :  { %1419 = vmatprep.mubr.msk.f32.mxu0 %vm310_vm0, %v200_v13  ;;  %v210_v33 = vld [vmem:[#allocation9 + $0x60] sm:$0xff]  ;;  %v228_v34 = vld [vmem:[#allocation11 + $0x70] sm:$0xff]  ;;  %v229_v35 = vld [vmem:[#allocation11 + $0x78] sm:$0xff] }
  0xcf   :  { %252 = vperm.xlu0 %1655, %v218_v14   ;;  %v211_v36 = vld [vmem:[#allocation9 + $0x68] sm:$0xff]  ;;  %v212_v37 = vld [vmem:[#allocation9 + $0x70] sm:$0xff]  ;;  %v528_v38 = vld [vmem:[#allocation14] sm:$0xff] }
  0xd0   :  { %257 = vperm.xlu1 %1656, %v219_v15   ;;  %v529_v39 = vld [vmem:[#allocation14 + $0x8] sm:$0xff]  ;;  %v213_v40 = vld [vmem:[#allocation9 + $0x78] sm:$0xff]  ;;  %v530_v41 = vld [vmem:[#allocation14 + $0x10] sm:$0xff] }
  0xd1   :  { %1420 = vmatmul.mubr.msk.f32.gmra.mrb[2].mxu0 %vm310_vm0, %v201_v16  ;;  %v531_v42 = vld [vmem:[#allocation14 + $0x18] sm:$0xff]  ;;  %v532_v43 = vld [vmem:[#allocation14 + $0x20] sm:$0xff]  ;;  %v533_v44 = vld [vmem:[#allocation14 + $0x28] sm:$0xff] }
  0xd2   :  { %1422 = vmatprep.mubr.msk.f32.mxu0 %vm310_vm0, %v202_v17  ;;  %v534_v45 = vld [vmem:[#allocation14 + $0x30] sm:$0xff]  ;;  %v535_v46 = vld [vmem:[#allocation14 + $0x38] sm:$0xff]  ;;  %v810_v47 = vld [vmem:[#allocation17] sm:$0xff] }
  0xd3   :  { %262 = vperm.xlu0 %1655, %v220_v18   ;;  %v811_v48 = vld [vmem:[#allocation17 + $0x8] sm:$0xff]  ;;  %v812_v49 = vld [vmem:[#allocation17 + $0x10] sm:$0xff]  ;;  %v813_v50 = vld [vmem:[#allocation17 + $0x18] sm:$0xff] }
  0xd4   :  { %267 = vperm.xlu1 %1656, %v221_v19   ;;  %v814_v51 = vld [vmem:[#allocation17 + $0x20] sm:$0xff]  ;;  %v815_v52 = vld [vmem:[#allocation17 + $0x28] sm:$0xff]  ;;  %v816_v53 = vld [vmem:[#allocation17 + $0x30] sm:$0xff] }
  0xd5   :  { %1423 = vmatmul.mubr.msk.f32.gmra.mrb[4].mxu0 %vm310_vm0, %v203_v20  ;;  %v817_v54 = vld [vmem:[#allocation17 + $0x38] sm:$0xff]  ;;  %v818_v55 = vld [vmem:[#allocation17 + $0x40] sm:$0xff]  ;;  %v819_v56 = vld [vmem:[#allocation17 + $0x48] sm:$0xff] }
  0xd6   :  { %1425 = vmatprep.mubr.msk.f32.mxu0 %vm310_vm0, %v204_v21  ;;  %v820_v57 = vld [vmem:[#allocation17 + $0x50] sm:$0xff]  ;;  %v821_v58 = vld [vmem:[#allocation17 + $0x58] sm:$0xff]  ;;  %v822_v59 = vld [vmem:[#allocation17 + $0x60] sm:$0xff] }
  0xd7   :  { %272 = vperm.xlu0 %1655, %v222_v22   ;;  %v823_v60 = vld [vmem:[#allocation17 + $0x68] sm:$0xff]  ;;  %v824_v61 = vld [vmem:[#allocation17 + $0x70] sm:$0xff]  ;;  %v825_v62 = vld [vmem:[#allocation17 + $0x78] sm:$0xff] }
  0xd8   :  { %277 = vperm.xlu1 %1656, %v223_v23   ;;  %v1117_v63 = vld [vmem:[#allocation20] sm:$0xff]  ;;  %v520_v0 = vld [vmem:[#allocation12] sm:$0xff] }
  0xd9   :  { %1426 = vmatmul.mubr.msk.f32.gmra.mrb[6].mxu0 %vm310_vm0, %v205_v24  ;;  %1472 = vmatprep.mubr.f32.mxu1 %v520_v0 }
  0xda   :  { %1428 = vmatprep.mubr.msk.f32.mxu0 %vm310_vm0, %v206_v25 }
  0xdb   :  { %282 = vperm.xlu0 %1655, %v224_v26  }
  0xdc   :  { %287 = vperm.xlu1 %1656, %v225_v27  }
  0xdd   :  { %1429 = vmatmul.mubr.msk.f32.gmra.mrb[8].mxu0 %vm310_vm0, %v207_v28 }
  0xde   :  { %1431 = vmatprep.mubr.msk.f32.mxu0 %vm310_vm0, %v208_v29 }
  0xdf   :  { %292 = vperm.xlu0 %1655, %v226_v30  }
  0xe0   :  { %297 = vperm.xlu1 %1656, %v227_v31  }
  0xe1   :  { %1432 = vmatmul.mubr.msk.f32.gmra.mrb[10].mxu0 %vm310_vm0, %v209_v32 }
  0xe2   :  { %1434 = vmatprep.mubr.msk.f32.mxu0 %vm310_vm0, %v210_v33 }
  0xe3   :  { %302 = vperm.xlu0 %1655, %v228_v34  }
  0xe4   :  { %307 = vperm.xlu1 %1656, %v229_v35  }
  0xe5   :  { %1435 = vmatmul.mubr.msk.f32.gmra.mrb[12].mxu0 %vm310_vm0, %v211_v36 }
  0xe6   :  { %1437 = vmatprep.mubr.msk.f32.mxu0 %vm310_vm0, %v212_v37 }
  0xe7   :  { %538 = vperm.xlu0 %1655, %v528_v38  }
  0xe8   :  { %543 = vperm.xlu1 %1656, %v529_v39  }
  0xe9   :  { %1438 = vmatmul.mubr.msk.f32.gmra.mrb[14].mxu0 %vm310_vm0, %v213_v40 }
  0xeb   :  { %548 = vperm.xlu0 %1655, %v530_v41  }
  0xec   :  { %553 = vperm.xlu1 %1656, %v531_v42  }
  0xef   :  { %558 = vperm.xlu0 %1655, %v532_v43  }
  0xf0   :  { %563 = vperm.xlu1 %1656, %v533_v44  }
  0xf3   :  { %568 = vperm.xlu0 %1655, %v534_v45  }
  0xf4   :  { %573 = vperm.xlu1 %1656, %v535_v46  }
  0xf7   :  { %828 = vperm.xlu0 %1655, %v810_v47  }
  0xf8   :  { %833 = vperm.xlu1 %1656, %v811_v48  }
  0xfb   :  { %838 = vperm.xlu0 %1655, %v812_v49  }
  0xfc   :  { %843 = vperm.xlu1 %1656, %v813_v50  }
  0xff   :  { %848 = vperm.xlu0 %1655, %v814_v51  }
 0x100   :  { %853 = vperm.xlu1 %1656, %v815_v52  }
 0x103   :  { %858 = vperm.xlu0 %1655, %v816_v53  }
 0x104   :  { %863 = vperm.xlu1 %1656, %v817_v54  }
 0x107   :  { %868 = vperm.xlu0 %1655, %v818_v55  }
 0x108   :  { %873 = vperm.xlu1 %1656, %v819_v56  }
 0x10b   :  { %878 = vperm.xlu0 %1655, %v820_v57  }
 0x10c   :  { %883 = vperm.xlu1 %1656, %v821_v58  }
 0x10f   :  { %888 = vperm.xlu0 %1655, %v822_v59  }
 0x110   :  { %893 = vperm.xlu1 %1656, %v823_v60  }
 0x113   :  { %898 = vperm.xlu0 %1655, %v824_v61  }
 0x114   :  { %903 = vperm.xlu1 %1656, %v825_v62  }
 0x117   :  { %1120 = vperm.xlu0 %1655, %v1117_v63  }
 0x146   :  { %v243_v2 = vpop.permute.xlu1 %242  ;;  %v233_v3 = vpop.permute.xlu0 %232 }
 0x14a   :  { %v238_v5 = vpop.permute.xlu0 %237 }
 0x14b   :  { %v248_v4 = vpop.permute.xlu1 %247 }
 0x14e   :  { %v253_v7 = vpop.permute.xlu0 %252 }
 0x14f   :  { %v258_v6 = vpop.permute.xlu1 %257 }
 0x152   :  { %v263_v16 = vpop.permute.xlu0 %262 }
 0x153   :  { %v268_v13 = vpop.permute.xlu1 %267 }
 0x156   :  { %v273_v29 = vpop.permute.xlu0 %272 }
 0x157   :  { %v278_v26 = vpop.permute.xlu1 %277 }
 0x15a   :  { %v283_v41 = vpop.permute.xlu0 %282 }
 0x15b   :  { %v288_v38 = vpop.permute.xlu1 %287 }
 0x15e   :  { %v293_v54 = vpop.permute.xlu0 %292 }
 0x15f   :  { %v298_v51 = vpop.permute.xlu1 %297 }
 0x163   :  { %v308_v63 = vpop.permute.xlu1 %307 }
 0x1a0   :  { %v1418_v8 = vpop.f32.mrb[0].mxu0 }
 0x1a1   :  { %v431_v9 = vadd.f32 %v1418_v8, %v238_v5  ;;  %v425_v10 = vpop.f32.mrb[1].mxu0 }
 0x1a2   :  { %v426_v11 = vadd.f32 %v425_v10, %v233_v3  ;;  %v303_v3 = vpop.permute.xlu0 %302 }
 0x1a3   :  { %v505_v12 = vmax.f32 %v431_v9, 0.0 }
 0x1a4   :  { %v504_v14 = vmax.f32 %v426_v11, 0.0  ;;  %v1421_v15 = vpop.f32.mrb[2].mxu0  ;;  %v521_v11 = vld [vmem:[#allocation12 + $0x8] sm:$0xff] }
 0x1a5   :  { %v441_v17 = vadd.f32 %v1421_v15, %v248_v4  ;;  %v435_v18 = vpop.f32.mrb[3].mxu0  ;;  %v525_v15 = vld [vmem:[#allocation12 + $0x28] sm:$0xff] }
 0x1a6   :  { %v436_v19 = vadd.f32 %v435_v18, %v243_v2  ;;  %v1559_v20 = vpack.c.bf16 %v505_v12, %v504_v14  ;;  %v522_v12 = vld [vmem:[#allocation12 + $0x10] sm:$0xff]  ;;  %v524_v14 = vld [vmem:[#allocation12 + $0x20] sm:$0xff] }
 0x1a7   :  { %v507_v21 = vmax.f32 %v441_v17, 0.0  ;;  %v527_v17 = vld [vmem:[#allocation12 + $0x38] sm:$0xff]  ;;  %v794_v18 = vld [vmem:[#allocation15] sm:$0xff] }
 0x1a8   :  { %v506_v22 = vmax.f32 %v436_v19, 0.0  ;;  %v1424_v23 = vpop.f32.mrb[4].mxu0  ;;  %1560 = vmatprep.subr.bf16.mxu1 %v1559_v20  ;;  %1500 = vmatprep.mubr.msk.f32.mxu0 %vm906_vm1, %v794_v18  ;;  %v544_v19 = vpop.permute.xlu1 %543 }
 0x1a9   :  { %v451_v24 = vadd.f32 %v1424_v23, %v258_v6  ;;  %v445_v25 = vpop.f32.mrb[5].mxu0  ;;  %1562 = vmatpush3.bf16.msra.mxu1 %v1559_v20  ;;  %v539_v20 = vpop.permute.xlu0 %538 }
 0x1aa   :  { %v1563_v27 = vpack.c.bf16 %v507_v21, %v506_v22  ;;  %v446_v28 = vadd.f32 %v445_v25, %v253_v7 }
 0x1ab   :  { %v509_v30 = vmax.f32 %v451_v24, 0.0 }
 0x1ac   :  { %v508_v31 = vmax.f32 %v446_v28, 0.0  ;;  %v1427_v32 = vpop.f32.mrb[6].mxu0  ;;  %1564 = vmatprep.subr.bf16.mxu1 %v1563_v27  ;;  %v554_v21 = vpop.permute.xlu1 %553 }
 0x1ad   :  { %v461_v33 = vadd.f32 %v1427_v32, %v268_v13  ;;  %v455_v34 = vpop.f32.mrb[7].mxu0  ;;  %1566 = vmatpush3.bf16.msra.mxu1 %v1563_v27  ;;  %v523_v13 = vld [vmem:[#allocation12 + $0x18] sm:$0xff]  ;;  %v549_v23 = vpop.permute.xlu0 %548 }
 0x1ae   :  { %v1567_v35 = vpack.c.bf16 %v509_v30, %v508_v31  ;;  %v456_v36 = vadd.f32 %v455_v34, %v263_v16  ;;  %v526_v16 = vld [vmem:[#allocation12 + $0x30] sm:$0xff] }
 0x1af   :  { %v511_v37 = vmax.f32 %v461_v33, 0.0 }
 0x1b0   :  { %v510_v39 = vmax.f32 %v456_v36, 0.0  ;;  %v1430_v40 = vpop.f32.mrb[8].mxu0  ;;  %1568 = vmatprep.subr.bf16.mxu1 %v1567_v35  ;;  %v564_v31 = vpop.permute.xlu1 %563 }
 0x1b1   :  { %v471_v42 = vadd.f32 %v1430_v40, %v278_v26  ;;  %v465_v43 = vpop.f32.mrb[9].mxu0  ;;  %1570 = vmatpush3.bf16.msra.mxu1 %v1567_v35  ;;  %v559_v33 = vpop.permute.xlu0 %558 }
 0x1b2   :  { %v1571_v44 = vpack.c.bf16 %v511_v37, %v510_v39  ;;  %v466_v45 = vadd.f32 %v465_v43, %v273_v29 }
 0x1b3   :  { %v513_v46 = vmax.f32 %v471_v42, 0.0 }
 0x1b4   :  { %v512_v47 = vmax.f32 %v466_v45, 0.0  ;;  %v1433_v48 = vpop.f32.mrb[10].mxu0  ;;  %1572 = vmatprep.subr.bf16.mxu1 %v1571_v44  ;;  %v574_v39 = vpop.permute.xlu1 %573 }
 0x1b5   :  { %v481_v49 = vadd.f32 %v1433_v48, %v288_v38  ;;  %v475_v50 = vpop.f32.mrb[11].mxu0  ;;  %1574 = vmatpush3.bf16.msra.mxu1 %v1571_v44  ;;  %v569_v42 = vpop.permute.xlu0 %568  ;;  %v796_v48 = vld [vmem:[#allocation15 + $0x10] sm:$0xff] }
 0x1b6   :  { %v1575_v52 = vpack.c.bf16 %v513_v46, %v512_v47  ;;  %v476_v53 = vadd.f32 %v475_v50, %v283_v41  ;;  %v795_v47 = vld [vmem:[#allocation15 + $0x8] sm:$0xff]  ;;  %v798_v50 = vld [vmem:[#allocation15 + $0x20] sm:$0xff] }
 0x1b7   :  { %v515_v55 = vmax.f32 %v481_v49, 0.0  ;;  %v797_v49 = vld [vmem:[#allocation15 + $0x18] sm:$0xff] }
 0x1b8   :  { %v514_v56 = vmax.f32 %v476_v53, 0.0  ;;  %v1436_v57 = vpop.f32.mrb[12].mxu0  ;;  %1576 = vmatprep.subr.bf16.mxu1 %v1575_v52  ;;  %v801_v53 = vld [vmem:[#allocation15 + $0x38] sm:$0xff] }
 0x1b9   :  { %v491_v58 = vadd.f32 %v1436_v57, %v298_v51  ;;  %v485_v59 = vpop.f32.mrb[13].mxu0  ;;  %1578 = vmatpush3.bf16.msra.mxu1 %v1575_v52  ;;  %v799_v51 = vld [vmem:[#allocation15 + $0x28] sm:$0xff]  ;;  %v800_v52 = vld [vmem:[#allocation15 + $0x30] sm:$0xff]  ;;  %v805_v57 = vld [vmem:[#allocation15 + $0x58] sm:$0xff] }
 0x1ba   :  { %v1579_v60 = vpack.c.bf16 %v515_v55, %v514_v56  ;;  %v486_v61 = vadd.f32 %v485_v59, %v293_v54  ;;  %v802_v54 = vld [vmem:[#allocation15 + $0x40] sm:$0xff]  ;;  %v803_v55 = vld [vmem:[#allocation15 + $0x48] sm:$0xff]  ;;  %v804_v56 = vld [vmem:[#allocation15 + $0x50] sm:$0xff] }
 0x1bb   :  { %v517_v62 = vmax.f32 %v491_v58, 0.0  ;;  %v806_v58 = vld [vmem:[#allocation15 + $0x60] sm:$0xff]  ;;  %v807_v59 = vld [vmem:[#allocation15 + $0x68] sm:$0xff] }
 0x1bc   :  { %v516_v0 = vmax.f32 %v486_v61, 0.0  ;;  %v1439_v2 = vpop.f32.mrb[14].mxu0  ;;  %1580 = vmatprep.subr.bf16.mxu1 %v1579_v60  ;;  %v809_v61 = vld [vmem:[#allocation15 + $0x78] sm:$0xff] }
 0x1bd   :  { %v501_v4 = vadd.f32 %v1439_v2, %v308_v63  ;;  %v495_v5 = vpop.f32.mrb[15].mxu0  ;;  %1582 = vmatpush3.bf16.msra.mxu1 %v1579_v60  ;;  %v808_v60 = vld [vmem:[#allocation15 + $0x70] sm:$0xff]  ;;  %v1997_v63 = vmov 0.0   ;;  %v829_v2 = vpop.permute.xlu0 %828 }
 0x1be   :  { %v1583_v6 = vpack.c.bf16 %v517_v62, %v516_v0  ;;  %v496_v7 = vadd.f32 %v495_v5, %v303_v3  ;;  %v1995_v62 = vmov 0.0|0.0   ;;  %v834_v0 = vpop.permute.xlu1 %833 }
 0x1bf   :  { %v519_v8 = vmax.f32 %v501_v4, 0.0 }
 0x1c0   :  { %v518_v9 = vmax.f32 %v496_v7, 0.0  ;;  %1584 = vmatprep.subr.bf16.mxu1 %v1583_v6 }
 0x1c1   :  { %1586 = vmatpush3.bf16.msra.mxu1 %v1583_v6  ;;  %v839_v4 = vpop.permute.xlu0 %838 }
 0x1c2   :  { %v1587_v10 = vpack.c.bf16 %v519_v8, %v518_v9  ;;  %v844_v3 = vpop.permute.xlu1 %843 }
 0x1c4   :  { %1588 = vmatprep.subr.bf16.mxu1 %v1587_v10 }
 0x1c5   :  { %1590 = vmatpush3.bf16.msra.mxu1 %v1587_v10  ;;  %v849_v6 = vpop.permute.xlu0 %848 }
 0x1c6   :  { %1607 = vmatprep.subr.bf16.mxu1 %v1995_v62  ;;  %v854_v5 = vpop.permute.xlu1 %853 }
 0x1c8   :  { %1473 = vmatmul.mubr.f32.vlgmr.msra.gmra.mrb[0].mxu1 %v521_v11 }
 0x1c9   :  { %1475 = vmatprep.mubr.f32.mxu1 %v522_v12 }
 0x1ca   :  { %v864_v12 = vpop.permute.xlu1 %863 }
 0x1cc   :  { %1476 = vmatmul.mubr.f32.gmra.mrb[2].mxu1 %v523_v13 }
 0x1cd   :  { %1478 = vmatprep.mubr.f32.mxu1 %v524_v14 }
 0x1d0   :  { %1479 = vmatmul.mubr.f32.gmra.mrb[4].mxu1 %v525_v15  ;;  %v859_v15 = vpop.permute.xlu0 %858 }
 0x1d1   :  { %1481 = vmatprep.mubr.f32.mxu1 %v526_v16 }
 0x1d4   :  { %1482 = vmatmul.mubr.f32.gmra.mrb[6].mxu1 %v527_v17 }
 0x1d5   :  { %1556 = vmatprep.mubr.msk.f32.mxu1 %vm1996_vm2, %v1997_v63 }
 0x29b   :  { %v1474_v22 = vpop.f32.mrb[0].mxu1 }
 0x29c   :  { %v648_v24 = vadd.f32 %v1474_v22, %v544_v19  ;;  %v642_v25 = vpop.f32.mrb[1].mxu1 }
 0x29d   :  { %v643_v26 = vadd.f32 %v642_v25, %v539_v20  ;;  %v874_v25 = vpop.permute.xlu1 %873 }
 0x29f   :  { %v1591_v27 = vpack.c.bf16 %v648_v24, %v643_v26  ;;  %v1477_v28 = vpop.f32.mrb[2].mxu1  ;;  %681 = vxpose.xlu0.b32.start [1/8] (short) %v643_v26, 128 }
 0x2a0   :  { %v658_v29 = vadd.f32 %v1477_v28, %v554_v21  ;;  %v652_v30 = vpop.f32.mrb[3].mxu1  ;;  %v869_v28 = vpop.permute.xlu0 %868 }
 0x2a1   :  { %v653_v32 = vadd.f32 %v652_v30, %v549_v23  ;;  %1592 = vmatprep.subr.bf16.mxu0 %v1591_v27 }
 0x2a2   :  { %1594 = vmatpush3.bf16.msra.mxu0 %v1591_v27 }
 0x2a3   :  { %v1595_v34 = vpack.c.bf16 %v658_v29, %v653_v32  ;;  %v1480_v35 = vpop.f32.mrb[4].mxu1  ;;  %682 = vxpose.xlu0.b32.cont [2/8] (short) %v648_v24, 128 }
 0x2a4   :  { %v668_v36 = vadd.f32 %v1480_v35, %v564_v31  ;;  %v662_v37 = vpop.f32.mrb[5].mxu1 }
 0x2a5   :  { %v663_v38 = vadd.f32 %v662_v37, %v559_v33  ;;  %1596 = vmatprep.subr.bf16.mxu0 %v1595_v34  ;;  %v884_v37 = vpop.permute.xlu1 %883 }
 0x2a6   :  { %1598 = vmatpush3.bf16.msra.mxu0 %v1595_v34 }
 0x2a7   :  { %v1599_v40 = vpack.c.bf16 %v668_v36, %v663_v38  ;;  %v1483_v41 = vpop.f32.mrb[6].mxu1  ;;  %683 = vxpose.xlu0.b32.cont [3/8] (short) %v653_v32, 128 }
 0x2a8   :  { %v678_v43 = vadd.f32 %v1483_v41, %v574_v39  ;;  %v672_v44 = vpop.f32.mrb[7].mxu1 }
 0x2a9   :  { %v673_v45 = vadd.f32 %v672_v44, %v569_v42  ;;  %1600 = vmatprep.subr.bf16.mxu0 %v1599_v40 }
 0x2aa   :  { %1602 = vmatpush3.bf16.msra.mxu0 %v1599_v40  ;;  %v879_v40 = vpop.permute.xlu0 %878 }
 0x2ab   :  { %v1603_v46 = vpack.c.bf16 %v678_v43, %v673_v45  ;;  %684 = vxpose.xlu0.b32.cont [4/8] (short) %v658_v29, 128 }
 0x2ad   :  { %1604 = vmatprep.subr.bf16.mxu0 %v1603_v46 }
 0x2ae   :  { %1606 = vmatpush3.bf16.msra.mxu0 %v1603_v46 }
 0x2af   :  { %685 = vxpose.xlu0.b32.cont [5/8] (short) %v663_v38, 128 }
 0x2b1   :  { %1501 = vmatmul.mubr.msk.f32.vlgmr.msra.gmra.mrb[16].mxu0 %vm906_vm1, %v795_v47 }
 0x2b2   :  { %1503 = vmatprep.mubr.msk.f32.mxu0 %vm906_vm1, %v796_v48 }
 0x2b3   :  { %686 = vxpose.xlu0.b32.cont [6/8] (short) %v668_v36, 128 }
 0x2b5   :  { %1504 = vmatmul.mubr.msk.f32.gmra.mrb[18].mxu0 %vm906_vm1, %v797_v49 }
 0x2b6   :  { %1506 = vmatprep.mubr.msk.f32.mxu0 %vm906_vm1, %v798_v50  ;;  %v894_v50 = vpop.permute.xlu1 %893 }
 0x2b7   :  { %687 = vxpose.xlu0.b32.cont [7/8] (short) %v673_v45, 128 }
 0x2b9   :  { %1507 = vmatmul.mubr.msk.f32.gmra.mrb[20].mxu0 %vm906_vm1, %v799_v51 }
 0x2ba   :  { %1509 = vmatprep.mubr.msk.f32.mxu0 %vm906_vm1, %v800_v52  ;;  %v904_v63 = vpop.permute.xlu1 %903 }
 0x2bb   :  { %688 = vxpose.xlu0.b32.end [8/8] (short) %v678_v43, 128 }
 0x2bd   :  { %1510 = vmatmul.mubr.msk.f32.gmra.mrb[22].mxu0 %vm906_vm1, %v801_v53  ;;  %v889_v53 = vpop.permute.xlu0 %888 }
 0x2be   :  { %1512 = vmatprep.mubr.msk.f32.mxu0 %vm906_vm1, %v802_v54 }
 0x2c1   :  { %1513 = vmatmul.mubr.msk.f32.gmra.mrb[24].mxu0 %vm906_vm1, %v803_v55 }
 0x2c2   :  { %1515 = vmatprep.mubr.msk.f32.mxu0 %vm906_vm1, %v804_v56 }
 0x2c5   :  { %1516 = vmatmul.mubr.msk.f32.gmra.mrb[26].mxu0 %vm906_vm1, %v805_v57 }
 0x2c6   :  { %1518 = vmatprep.mubr.msk.f32.mxu0 %vm906_vm1, %v806_v58 }
 0x2c9   :  { %1519 = vmatmul.mubr.msk.f32.gmra.mrb[28].mxu0 %vm906_vm1, %v807_v59 }
 0x2ca   :  { %1521 = vmatprep.mubr.msk.f32.mxu0 %vm906_vm1, %v808_v60 }
 0x2cd   :  { %1522 = vmatmul.mubr.msk.f32.gmra.mrb[30].mxu0 %vm906_vm1, %v809_v61 }
 0x384   :  { %v1502_v7 = vpop.f32.mrb[16].mxu0 }
 0x385   :  { %v1027_v8 = vadd.f32 %v1502_v7, %v834_v0  ;;  %v1021_v9 = vpop.f32.mrb[17].mxu0 }
 0x386   :  { %v1022_v10 = vadd.f32 %v1021_v9, %v829_v2 }
 0x387   :  { %v1101_v11 = vmax.f32 %v1027_v8, 0.0 }
 0x388   :  { %v1100_v13 = vmax.f32 %v1022_v10, 0.0  ;;  %v1505_v14 = vpop.f32.mrb[18].mxu0 }
 0x389   :  { %v1037_v16 = vadd.f32 %v1505_v14, %v844_v3  ;;  %v1031_v17 = vpop.f32.mrb[19].mxu0  ;;  %v899_v3 = vpop.permute.xlu0 %898  ;;  %v1200_v14 = vstv %s2356_s0  ;;  %s1998_s0 = smov [#allocation22]  }
 0x38a   :  { %v1608_v18 = vpack.c.bf16 %v1101_v11, %v1100_v13  ;;  %v1032_v19 = vadd.f32 %v1031_v17, %v839_v4  ;;  %v1116_v11 = vld [vmem:[#allocation18] sm:$0xff]  ;;  %s1233_s29 = sshll.u32 %s1998_s0, 4  ;;  %s1234_s29 = int_to_ptr.vmem [resolvable:$true] %s1233_s29 }
 0x38b   :  { %v1103_v20 = vmax.f32 %v1037_v16, 0.0  ;;  %s1899_s16 = scalar_lea.vmem %s1234_s29, 1024  ;;  %p1904_p5 = scmp.lt.s32.totalorder %s1234_s29, %s1234_s29 }
 0x38c   :  { %v1102_v21 = vmax.f32 %v1032_v19, 0.0  ;;  %v1508_v22 = vpop.f32.mrb[20].mxu0  ;;  %1609 = vmatpush3.bf16.msra.mxu1 %v1608_v18  ;;  %p1900_p4 = scmp.ne.s32.totalorder %s1234_s29, %s1899_s16  ;;  %p1905_p6 = scmp.lt.s32.totalorder %s1899_s16, %s1899_s16 }
 0x38d   :  { %v1047_v23 = vadd.f32 %v1508_v22, %v854_v5  ;;  %v1041_v24 = vpop.f32.mrb[21].mxu0  ;;  %1610 = vmatprep.subr.bf16.mxu1 %v1995_v62 }
 0x38e   :  { %v1611_v26 = vpack.c.bf16 %v1103_v20, %v1102_v21  ;;  %v1042_v27 = vadd.f32 %v1041_v24, %v849_v6  ;;  %p1906_p7 = por %p1905_p6, %p1904_p5 }
 0x38f   :  { %v1105_v29 = vmax.f32 %v1047_v23, 0.0 }
 0x390   :  { %v1104_v30 = vmax.f32 %v1042_v27, 0.0  ;;  %v1511_v31 = vpop.f32.mrb[22].mxu0  ;;  %1612 = vmatpush3.bf16.msra.mxu1 %v1611_v26  ;;  %p1907_p8 = pnand %p1906_p7, %p1900_p4 }
 0x391   :  { %v1057_v32 = vadd.f32 %v1511_v31, %v864_v12  ;;  %v1051_v33 = vpop.f32.mrb[23].mxu0  ;;  %1613 = vmatprep.subr.bf16.mxu1 %v1995_v62  ;;  %v1194_v12 = vlaneseq }
 0x392   :  { %v1614_v34 = vpack.c.bf16 %v1105_v29, %v1104_v30  ;;  %v1052_v35 = vadd.f32 %v1051_v33, %v859_v15  ;;  %v1121_v15 = vpop.permute.xlu0 %1120 }
 0x393   :  { %v1107_v36 = vmax.f32 %v1057_v32, 0.0  ;;  %v1195_v13 = vand.u32 127, %v1194_v12 }
 0x394   :  { %v1106_v38 = vmax.f32 %v1052_v35, 0.0  ;;  %v1514_v39 = vpop.f32.mrb[24].mxu0  ;;  %1615 = vmatpush3.bf16.msra.mxu1 %v1614_v34 }
 0x395   :  { %v1067_v41 = vadd.f32 %v1514_v39, %v874_v25  ;;  %v1061_v42 = vpop.f32.mrb[25].mxu0  ;;  %1616 = vmatprep.subr.bf16.mxu1 %v1995_v62  ;;  %vm1201_vm3 = vcmp.lt.s32.totalorder %v1195_v13, %v1200_v14 }
 0x396   :  { %v1617_v43 = vpack.c.bf16 %v1107_v36, %v1106_v38  ;;  %v1062_v44 = vadd.f32 %v1061_v42, %v869_v28  ;;  %v697_v21 = vpop.trf.xlu0 }
 0x397   :  { %v1109_v45 = vmax.f32 %v1067_v41, 0.0  ;;  %v1316_v22 = vpack.c.bf16 %v697_v21, %v697_v21 }
 0x398   :  { %v1108_v46 = vmax.f32 %v1062_v44, 0.0  ;;  %v1517_v47 = vpop.f32.mrb[26].mxu0  ;;  %1618 = vmatpush3.bf16.msra.mxu1 %v1617_v43 }
 0x399   :  { %v1077_v48 = vadd.f32 %v1517_v47, %v884_v37  ;;  %v1071_v49 = vpop.f32.mrb[27].mxu0  ;;  %1619 = vmatprep.subr.bf16.mxu1 %v1995_v62  ;;  %778 = vst.msk [vmem:[#allocation22] sm:$0xf] %vm777_vm4, %v1316_v22 }
 0x39a   :  { %v1620_v51 = vpack.c.bf16 %v1109_v45, %v1108_v46  ;;  %v1072_v52 = vadd.f32 %v1071_v49, %v879_v40  ;;  %v698_v23 = vpop.trf.xlu0 }
 0x39b   :  { %v1111_v54 = vmax.f32 %v1077_v48, 0.0  ;;  %v1317_v24 = vpack.c.bf16 %v698_v23, %v698_v23 }
 0x39c   :  { %v1110_v55 = vmax.f32 %v1072_v52, 0.0  ;;  %v1520_v56 = vpop.f32.mrb[28].mxu0  ;;  %1621 = vmatpush3.bf16.msra.mxu1 %v1620_v51 }
 0x39d   :  { %v1087_v57 = vadd.f32 %v1520_v56, %v894_v50  ;;  %v1081_v58 = vpop.f32.mrb[29].mxu0  ;;  %1622 = vmatprep.subr.bf16.mxu1 %v1995_v62  ;;  %779 = vst.msk [vmem:[#allocation22 + $0x4] sm:$0xf] %vm777_vm4, %v1317_v24 }
 0x39e   :  { %v1623_v59 = vpack.c.bf16 %v1111_v54, %v1110_v55  ;;  %v1082_v60 = vadd.f32 %v1081_v58, %v889_v53  ;;  %v699_v25 = vpop.trf.xlu0 }
 0x39f   :  { %v1113_v61 = vmax.f32 %v1087_v57, 0.0  ;;  %v1318_v26 = vpack.c.bf16 %v699_v25, %v699_v25 }
 0x3a0   :  { %v1112_v0 = vmax.f32 %v1082_v60, 0.0  ;;  %v1523_v2 = vpop.f32.mrb[30].mxu0  ;;  %1624 = vmatpush3.bf16.msra.mxu1 %v1623_v59 }
 0x3a1   :  { %v1097_v4 = vadd.f32 %v1523_v2, %v904_v63  ;;  %v1091_v5 = vpop.f32.mrb[31].mxu0  ;;  %1625 = vmatprep.subr.bf16.mxu1 %v1995_v62  ;;  %780 = vst.msk [vmem:[#allocation22 + $0x8] sm:$0xf] %vm777_vm4, %v1318_v26 }
 0x3a2   :  { %v1626_v6 = vpack.c.bf16 %v1113_v61, %v1112_v0  ;;  %v1092_v7 = vadd.f32 %v1091_v5, %v899_v3  ;;  %v700_v27 = vpop.trf.xlu0 }
 0x3a3   :  { %v1115_v8 = vmax.f32 %v1097_v4, 0.0  ;;  %v1319_v28 = vpack.c.bf16 %v700_v27, %v700_v27 }
 0x3a4   :  { %v1114_v9 = vmax.f32 %v1092_v7, 0.0  ;;  %1627 = vmatpush3.bf16.msra.mxu1 %v1626_v6 }
 0x3a5   :  { %1628 = vmatprep.subr.bf16.mxu1 %v1995_v62  ;;  %781 = vst.msk [vmem:[#allocation22 + $0xc] sm:$0xf] %vm777_vm4, %v1319_v28 }
 0x3a6   :  { %v1629_v10 = vpack.c.bf16 %v1115_v8, %v1114_v9 }
 0x3a8   :  { %1630 = vmatpush3.bf16.msra.mxu1 %v1629_v10 }
 0x3ab   :  { %1557 = vmatmul.mubr.f32.vlgmr.msra.gmra.mrb[8].mxu1 %v1116_v11 }
 0x47e   :  { %v1189_v16 = vpop.f32.mrb[8].mxu1 }
 0x47f   :  { %v1190_v17 = vadd.f32 %v1189_v16, %v1121_v15  ;;  %v1558_v18 = vpop.f32.mrb[9].mxu1 }
 0x481   :  { %v1202_v19 = vsub.f32 %v1190_v17, %v2256_v1  ;;  %1193 = vst [vmem:[#allocation21] sm:$0xff] %v1190_v17  ;;  %v701_v1 = vpop.trf.xlu0 }
 0x482   :  { %v1320_v29 = vpack.c.bf16 %v701_v1, %v701_v1 }
 0x483   :  { %v1205_v20 = vsel %vm1201_vm3, %v1202_v19, 0.0 }
 0x484   :  { %v1206_v62 = vmul.f32 %v1205_v20, %v1205_v20  ;;  %782 = vst.msk [vmem:[#allocation22 + $0x10] sm:$0xf] %vm777_vm4, %v1320_v29 }
 0x485   :  { %v702_v30 = vpop.trf.xlu0 }
 0x486   :  { %1207 = vadd.xlane.f32.xlu1 %v1206_v62  ;;  %v1321_v31 = vpack.c.bf16 %v702_v30, %v702_v30 }
 0x488   :  { %783 = vst.msk [vmem:[#allocation22 + $0x14] sm:$0xf] %vm777_vm4, %v1321_v31 }
 0x489   :  { %v703_v32 = vpop.trf.xlu0 }
 0x48a   :  { %v1322_v33 = vpack.c.bf16 %v703_v32, %v703_v32 }
 0x48c   :  { %784 = vst.msk [vmem:[#allocation22 + $0x18] sm:$0xf] %vm777_vm4, %v1322_v33 }
 0x48d   :  { %v704_v34 = vpop.trf.xlu0 }
 0x48e   :  { %v1323_v35 = vpack.c.bf16 %v704_v34, %v704_v34 }
 0x490   :  { %785 = vst.msk [vmem:[#allocation22 + $0x1c] sm:$0xf] %vm777_vm4, %v1323_v35 }
 0x491   :  { %v705_v36 = vpop.trf.xlu0 }
 0x492   :  { %v1324_v37 = vpack.c.bf16 %v705_v36, %v705_v36 }
 0x494   :  { %786 = vst.msk [vmem:[#allocation22 + $0x20] sm:$0xf] %vm777_vm4, %v1324_v37 }
 0x495   :  { %v706_v38 = vpop.trf.xlu0 }
 0x496   :  { %v1325_v39 = vpack.c.bf16 %v706_v38, %v706_v38 }
 0x498   :  { %787 = vst.msk [vmem:[#allocation22 + $0x24] sm:$0xf] %vm777_vm4, %v1325_v39 }
 0x499   :  { %v707_v40 = vpop.trf.xlu0 }
 0x49a   :  { %v1326_v41 = vpack.c.bf16 %v707_v40, %v707_v40 }
 0x49c   :  { %788 = vst.msk [vmem:[#allocation22 + $0x28] sm:$0xf] %vm777_vm4, %v1326_v41 }
 0x49d   :  { %v708_v42 = vpop.trf.xlu0 }
 0x49e   :  { %v1327_v43 = vpack.c.bf16 %v708_v42, %v708_v42 }
 0x4a0   :  { %789 = vst.msk [vmem:[#allocation22 + $0x2c] sm:$0xf] %vm777_vm4, %v1327_v43 }
 0x4a1   :  { %v709_v44 = vpop.trf.xlu0 }
 0x4a2   :  { %v1328_v45 = vpack.c.bf16 %v709_v44, %v709_v44 }
 0x4a4   :  { %790 = vst.msk [vmem:[#allocation22 + $0x30] sm:$0xf] %vm777_vm4, %v1328_v45 }
 0x4a5   :  { %v710_v46 = vpop.trf.xlu0 }
 0x4a6   :  { %v1329_v47 = vpack.c.bf16 %v710_v46, %v710_v46 }
 0x4a8   :  { %791 = vst.msk [vmem:[#allocation22 + $0x34] sm:$0xf] %vm777_vm4, %v1329_v47 }
 0x4a9   :  { %v711_v48 = vpop.trf.xlu0 }
 0x4aa   :  { %v1330_v49 = vpack.c.bf16 %v711_v48, %v711_v48 }
 0x4ac   :  { %792 = vst.msk [vmem:[#allocation22 + $0x38] sm:$0xf] %vm777_vm4, %v1330_v49 }
 0x4ad   :  { %v712_v50 = vpop.trf.xlu0 }
 0x4ae   :  { %v1331_v51 = vpack.c.bf16 %v712_v50, %v712_v50 }
 0x4b0   :  { %793 = vst.msk [vmem:[#allocation22 + $0x3c] sm:$0xf] %vm777_vm4, %v1331_v51 }
 0x4b1   :  { %1910 = shalt.err (!%p1907_p8)
}
 0x4b2   :  { %s1911_s19 = scalar_lea.hbm %s2369_s13, 1024 }
 0x4b3   :  { %p1912_p9 = scmp.ne.s32.totalorder %s2369_s13, %s1911_s19  ;;  %p1915_p10 = scmp.lt.u32.totalorder %s1911_s19, %s2369_s13 }
 0x4b5   :  { %p1917_p11 = pnand %p1915_p10, %p1912_p9 }
 0x4b7   :  { %1920 = shalt.err (!%p1917_p11)
}
 0x4b8   :  { %s2000_s7 = smov 64   ;;  %s2001_s28 = smov 4  }
 0x4b9   :  { %1239 = dma.vmem_to_hbm [thread:$0]  %s1234_s29, 1024, %s2369_s13, [#allocation23], %s2000_s7, %s2000_s7, %s2001_s28  }
 0x4ba   :  { %s1921_s15 = scalar_lea.vmem %s1225_s20, 128  ;;  %p1926_p13 = scmp.lt.s32.totalorder %s1225_s20, %s1225_s20 }
 0x4bb   :  { %p1922_p12 = scmp.ne.s32.totalorder %s1225_s20, %s1921_s15  ;;  %p1927_p0 = scmp.lt.s32.totalorder %s1921_s15, %s1921_s15 }
 0x4bd   :  { %p1928_p1 = por %p1927_p0, %p1926_p13 }
 0x4bf   :  { %p1929_p2 = pnand %p1928_p1, %p1922_p12 }
 0x4c1   :  { %1932 = shalt.err (!%p1929_p2)
}
 0x4c2   :  { %s1933_s1 = scalar_lea.hbm %s2368_s12, 128 }
 0x4c3   :  { %p1934_p3 = scmp.ne.s32.totalorder %s2368_s12, %s1933_s1  ;;  %p1937_p4 = scmp.lt.u32.totalorder %s1933_s1, %s2368_s12 }
 0x4c5   :  { %p1939_p5 = pnand %p1937_p4, %p1934_p3 }
 0x4c7   :  { %1942 = shalt.err (!%p1939_p5)
}
 0x4c8   :  { %1227 = dma.vmem_to_hbm [thread:$0]  %s1225_s20, 128, %s2368_s12, [#allocation5]  }
 0x4c9   :  { %s2002_s2 = smov [#allocation24]  }
 0x4ca   :  { %s1246_s11 = sshll.u32 %s2002_s2, 4  ;;  %s1247_s11 = int_to_ptr.vmem [resolvable:$true] %s1246_s11 }
 0x4cb   :  { %s1943_s0 = scalar_lea.vmem %s1247_s11, 128  ;;  %p1948_p7 = scmp.lt.s32.totalorder %s1247_s11, %s1247_s11 }
 0x4cc   :  { %p1944_p6 = scmp.ne.s32.totalorder %s1247_s11, %s1943_s0  ;;  %p1949_p8 = scmp.lt.s32.totalorder %s1943_s0, %s1943_s0 }
 0x4ce   :  { %p1950_p9 = por %p1949_p8, %p1948_p7 }
 0x4d0   :  { %p1951_p10 = pnand %p1950_p9, %p1944_p6 }
 0x513   :  { %v1208_v52 = vpop.xlane.xlu1 %1207 }
 0x514   :  { %v1209_v53 = vrot.slane %v1208_v52, 4 }
 0x516   :  { %v1210_v54 = vadd.f32 %v1209_v53, %v1208_v52 }
 0x518   :  { %v1211_v55 = vrot.slane %v1210_v54, 2 }
 0x51a   :  { %v1212_v56 = vadd.f32 %v1211_v55, %v1210_v54 }
 0x51c   :  { %v1213_v57 = vrot.slane %v1212_v56, 1 }
 0x51e   :  { %v1214_v58 = vadd.f32 %v1213_v57, %v1212_v56 }
 0x520   :  { %1631 = vpush %v1214_v58 }
 0x551   :  { %s1632_s30 = spop %1631 }
 0x552   :  { %v1216_v59 = vstv %s1632_s30 }
 0x553   :  { %1217 = vst [vmem:[#allocation24] sm:$0xff] %v1216_v59 }
 0x554   :  { %1954 = shalt.err (!%p1951_p10)
}
 0x555   :  { %s1955_s26 = scalar_lea.hbm %s2370_s14, 128 }
 0x556   :  { %p1956_p11 = scmp.ne.s32.totalorder %s2370_s14, %s1955_s26  ;;  %p1959_p12 = scmp.lt.u32.totalorder %s1955_s26, %s2370_s14 }
 0x558   :  { %p1961_p13 = pnand %p1959_p12, %p1956_p11 }
 0x55a   :  { %1964 = shalt.err (!%p1961_p13)
}
 0x55b   :  { %1249 = dma.vmem_to_hbm [thread:$0]  %s1247_s11, 128, %s2370_s14, [#allocation23]  }
 0x55c   :  { %1977 = dma.done.wait [#allocation5], 128  }
 0x55d   :  { %1978 = vsyncadd [#allocation5], 4294967168 }
 0x55e   :  { %1979 = dma.done.wait [#allocation23], 1152  }
 0x55f   :  { %1980 = vsyncadd [#allocation23], 4294966144 }
 0x560   :  { %1259 = vsyncpa [#allocation4], 1 }
 0x561   :  { %1260 = vsyncpa [#allocation7], 1 }
 0x562   :  { %1261 = vsyncpa [#allocation10], 1 }
 0x563   :  { %1262 = vsyncpa [#allocation13], 1 }
 0x564   :  { %1263 = vsyncpa [#allocation16], 1 }
 0x565   :  { %1264 = vsyncpa [#allocation19], 1 }
 0x566   :  { %1265 = vsyncpa [#allocation5], 1 }
 0x567   :  { %1266 = vsyncpa [#allocation23], 1 }

</bundles_post_ra>
